<compile_context>
chip_gen: v7x
topology: tpu7x:2x2x1
jax: 0.10.0
libtpu: 0.0.40
codegen_flags: <defaults>
</compile_context>

<pallas_src>
import functools

import jax
import jax.numpy as jnp
from jax.experimental import pallas as pl
from jax.experimental.pallas import tpu as pltpu

_LANE = 128
_TARGET_BLOCK_BYTES = 2 * 1024 * 1024  # per array per block


def _cdiv(a, b):
    return -(-a // b)


def _add_kernel(x_ref, y_ref, o_ref):
    # factor == 1: pure add on the VPU.
    o_ref[...] = x_ref[...] + y_ref[...]


def _add_scale_kernel(x_ref, y_ref, o_ref, *, inv_factor):
    # factor == 2: (x + y) * 0.5  (exact, bit-identical to /2).
    o_ref[...] = (x_ref[...] + y_ref[...]) * inv_factor


def add_mean_fusion(x, y, factor=1):
    """Pallas implementation of AddMeanFusion.forward: (x + y) / factor."""
    assert factor in (1, 2)
    assert x.shape == y.shape and x.dtype == y.dtype
    # TODO(synk): integer inputs would need torch-style true division (float
    # result); restrict to floating dtypes here.
    assert jnp.issubdtype(x.dtype, jnp.floating)

    orig_shape = x.shape
    total = int(x.size)
    if total == 0:
        return x + y  # degenerate empty tensor

    itemsize = jnp.dtype(x.dtype).itemsize
    # Sublane packing: 8 rows/vreg for 32-bit, 16 for 16-bit, 32 for 8-bit.
    packing = (4 // max(itemsize, 1)) * 8 if itemsize <= 4 else 8

    # --- lane-dense column width --------------------------------------------
    # Widest multiple of 128 (up to 1024) that divides `total` (so no padding
    # pass is needed) while still leaving >= 2 sublane-packed row groups.
    tile_c = _LANE
    for tc in (1024, 512, 256):
        if total % tc == 0 and total >= tc * packing * 2:
            tile_c = tc
            break

    # Pad the flat buffer only up to the next multiple of tile_c (< tile_c
    # elements).  Typical feature maps (total % 128 == 0) skip this entirely.
    # TODO(synk): for very large non-multiple-of-128 totals this jnp.pad costs
    # one extra HBM pass; acceptable for the rare ragged fallback.
    padded_total = _cdiv(total, tile_c) * tile_c
    rows = padded_total // tile_c

    # --- row tile: ~2 MiB per array per block, multiple of sublane packing ---
    tile_r = max(packing,
                 (_TARGET_BLOCK_BYTES // (tile_c * itemsize)) // packing * packing)
    tile_r = min(tile_r, _cdiv(rows, packing) * packing)
    # Guarantee >= 2 grid steps when there is enough work (v7x: 2 TensorCores).
    if tile_r >= rows and rows > packing:
        tile_r = _cdiv(_cdiv(rows, 2), packing) * packing
    tile_r = max(packing, tile_r)

    xf = x.reshape(-1)
    yf = y.reshape(-1)
    if padded_total != total:
        pad = padded_total - total
        xf = jnp.pad(xf, (0, pad))
        yf = jnp.pad(yf, (0, pad))
    x2 = xf.reshape(rows, tile_c)
    y2 = yf.reshape(rows, tile_c)

    grid = (_cdiv(rows, tile_r),)  # ragged last block handled by Pallas

    if factor == 1:
        kernel = _add_kernel
    else:
        kernel = functools.partial(_add_scale_kernel, inv_factor=1.0 / factor)

    out2 = pl.pallas_call(
        kernel,
        out_shape=jax.ShapeDtypeStruct((rows, tile_c), x.dtype),
        grid=grid,
        in_specs=[
            pl.BlockSpec((tile_r, tile_c), lambda i: (i, 0)),
            pl.BlockSpec((tile_r, tile_c), lambda i: (i, 0)),
        ],
        out_specs=pl.BlockSpec((tile_r, tile_c), lambda i: (i, 0)),
        compiler_params=pltpu.CompilerParams(
            dimension_semantics=("parallel",),
            vmem_limit_bytes=32 * 1024 * 1024,
        ),
    )(x2, y2)

    out_flat = out2.reshape(-1)
    if padded_total != total:
        out_flat = out_flat[:total]
    return out_flat.reshape(orig_shape)


if __name__ == "__main__":
    key = jax.random.PRNGKey(0)
    kx, ky = jax.random.split(key)

    # Small NCHW shapes consistent with a backbone feature map.
    N, Cc, H, W = 2, 4, 16, 16
    x = jax.random.normal(kx, (N, Cc, H, W), dtype=jnp.float32)
    y = jax.random.normal(ky, (N, Cc, H, W), dtype=jnp.float32)

    for factor in (1, 2):
        out = jax.block_until_ready(add_mean_fusion(x, y, factor=factor))
        ref = (x + y) / factor
        assert out.shape == ref.shape and out.dtype == ref.dtype
        assert jnp.allclose(out, ref, atol=1e-6, rtol=1e-6), (
            f"mismatch for factor={factor}"
        )

    # bfloat16 path (exercises 16-row sublane packing).
    xb = x.astype(jnp.bfloat16)
    yb = y.astype(jnp.bfloat16)
    outb = jax.block_until_ready(add_mean_fusion(xb, yb, factor=2))
    refb = (xb + yb) / 2
    assert jnp.allclose(outb.astype(jnp.float32), refb.astype(jnp.float32),
                        atol=2e-2, rtol=2e-2), "mismatch (bf16)"

    # Non-divisible element count exercises the flat-padding fallback.
    xs = jax.random.normal(kx, (2, 3, 7, 5), dtype=jnp.float32)
    ys = jax.random.normal(ky, (2, 3, 7, 5), dtype=jnp.float32)
    outs = jax.block_until_ready(add_mean_fusion(xs, ys, factor=2))
    refs = (xs + ys) / 2
    assert jnp.allclose(outs, refs, atol=1e-6, rtol=1e-6), "mismatch (ragged)"

    print("KERNEL_OK")
</pallas_src>

<mosaic_0001>
module attributes {stable_mosaic.version = 11 : i64} {
  func.func @_add_kernel(%arg0: i32, %arg1: memref<8x128xf32, #tpu.memory_space<vmem>>, %arg2: memref<8x128xf32, #tpu.memory_space<vmem>>, %arg3: memref<8x128xf32, #tpu.memory_space<vmem>>) attributes {dimension_semantics = [#tpu.dimension_semantics<parallel>], iteration_bounds = array<i64: 2>, scalar_prefetch = 0 : i64, scratch_operands = 0 : i64, tpu.core_type = #tpu.core_type<tc>, window_params = [{transform_indices = @transform_0, window_bounds = array<i64: 8, 128>}, {transform_indices = @transform_1, window_bounds = array<i64: 8, 128>}, {transform_indices = @transform_2, window_bounds = array<i64: 8, 128>}]} {
    %c0 = arith.constant 0 : index
    %c0_0 = arith.constant 0 : index
    %0 = vector.load %arg1[%c0, %c0_0] : memref<8x128xf32, #tpu.memory_space<vmem>>, vector<8x128xf32>
    %c0_1 = arith.constant 0 : index
    %c0_2 = arith.constant 0 : index
    %1 = vector.load %arg2[%c0_1, %c0_2] : memref<8x128xf32, #tpu.memory_space<vmem>>, vector<8x128xf32>
    %2 = arith.addf %0, %1 : vector<8x128xf32>
    %c0_3 = arith.constant 0 : index
    %c0_4 = arith.constant 0 : index
    %3 = vector.load %arg3[%c0_3, %c0_4] : memref<8x128xf32, #tpu.memory_space<vmem>>, vector<8x128xf32>
    tpu.vector_store %arg3[%c0_3, %c0_4], %2 {strides = array<i32>} : memref<8x128xf32, #tpu.memory_space<vmem>>, vector<8x128xf32>,
    return
  }
  func.func @transform_0(%arg0: i32) -> (i32, i32) {
    %c0_i32 = arith.constant 0 : i32
    %c0_i32_0 = arith.constant 0 : i32
    return %arg0, %c0_i32 : i32, i32
  }
  func.func @transform_1(%arg0: i32) -> (i32, i32) {
    %c0_i32 = arith.constant 0 : i32
    %c0_i32_0 = arith.constant 0 : i32
    return %arg0, %c0_i32 : i32, i32
  }
  func.func @transform_2(%arg0: i32) -> (i32, i32) {
    %c0_i32 = arith.constant 0 : i32
    %c0_i32_0 = arith.constant 0 : i32
    return %arg0, %c0_i32 : i32, i32
  }
}

</mosaic_0001>

<bundles_post_ra>
// kernel: tpu_custom_call.1
= control target key start
LH: loop header
LB: loop body
LE: loop exit
PB: predicated region body
PF: predicated region fallthrough
CT: control target
= control target key end

     0   :  { %7 = vsyncpa [#allocation3], 0  ;;  %s732_s0 = inlined_call_operand.hbm [shape: f32[16,128], index: 0, kind: input, shape index: {}]   ;;  %s733_s1 = inlined_call_operand.hbm [shape: f32[16,128], index: 1, kind: input, shape index: {}]   ;;  %s734_s2 = inlined_call_operand.hbm [shape: f32[16,128], index: 2, kind: output, shape index: {}]  }
   0x1   :  { %9 = vsyncpa [#allocation3 + $0x1], 0 }
   0x2   :  { %10 = vsyncpa [#allocation6], 0 }
   0x3   :  { %12 = vsyncpa [#allocation6 + $0x1], 0 }
   0x4   :  { %13 = vsyncpa [#allocation4], 0 }
   0x5   :  { %15 = vsyncpa [#allocation4 + $0x1], 0  ;;  %s523_s9 = smov 0   ;;  %s525_s10 = smov 0  }
   0x6   :  { %s527_s11 = smov 0   ;;  %s529_s12 = smov 0  }
   0x7 LB: > { %s544_s13 = sadd.s32 4294967295, %s503_s12   ;;  %s307_s14 = sadd.s32 4294967294, %s503_s12   ;;  %s503_s12 = sphi %s529_s12, %s753_s12   ;;  %s499_s11 = sphi %s527_s11, %s752_s11   ;;  %s495_s10 = sphi %s525_s10, %s751_s10   ;;  %s491_s9 = sphi %s523_s9, %s750_s9  }
   0x8   : > { %s548_s15 = sadd.s32 1, %s503_s12   ;;  %s28_s16 = sadd.s32 1, %s499_s11 }
   0x9   : > { %s25_s17 = ssub.s32 %s503_s12, %s548_s15  ;;  %p35_p0 = scmp.ne.s32.totalorder %s499_s11, %s495_s10 }
   0xa   : > { %p26_p1 = scmp.eq.s32.totalorder %s25_s17, 0  ;;  %p36_p2 = scmp.eq.s32.totalorder %s503_s12, 0 }
   0xb   : > { %p41_p3 = scmp.ne.s32.totalorder %s495_s10, %s491_s9  ;;  %p42_p4 = scmp.eq.s32.totalorder %s544_s13, 0 }
   0xc   : > { %s560_s18 = scalar_select %p26_p1, %s499_s11, %s28_s16  }
   0xd   : > { %p562_p5 = por %p36_p2, %p35_p0  ;;  %p566_p6 = por %p42_p4, %p41_p3 }
   0xe   : > { %p91_p7 = scmp.eq.s32.totalorder %s544_s13, 1  ;;  %p97_p8 = scmp.eq.s32.totalorder %s307_s14, 1 }
   0xf   : > { %s738_s20 = scalar_select %p566_p6, 1, 0 }
  0x10   : > { %p339_p10 = scmp.lt.s32.totalorder %s503_s12, 2  ;;  %p573_p11 = por %p91_p7, %p35_p0 }
  0x11   : > { %p577_p12 = por %p97_p8, %p41_p3  ;;  %s582_s23 = sand.u32 1, %s499_s11  }
  0x12   : > { %s739_s21 = scalar_select %p573_p11, 1, 0 }
  0x13   : > { %s740_s22 = scalar_select %p577_p12, 1, 0 }
  0x14   : > { %s311_s24 = sshll.u32 %s503_s12, 7  ;;  %s310_s25 = sshll.u32 %s582_s23, 3 }
  0x15   : > { %s591_s28 = scalar_lea.hbm %s732_s0, %s311_s24  ;;  %s121_s29 = scalar_lea.vmem [#allocation2], %s310_s25 }
  0x16   : > { %s128_s30 = sshll.u32 %s121_s29, 4  ;;  %p597_p13 = pnand %p339_p10, %p562_p5  ;;  %s601_s30 = int_to_ptr.vmem [resolvable:$true] %s128_s30 }
  0x17   : > { %s118_s4 = scalar_lea.sflag [#allocation3], %s582_s23  ;;  %s373_s5 = scalar_lea.hbm %s591_s28, 128 }
  0x18   : > { %p374_p2 = scmp.ne.s32.totalorder %s591_s28, %s373_s5  ;;  %p375_p3 = pneg %p597_p13 }
  0x19   : > { %s378_s8 = scalar_lea.hbm %s732_s0, 256  ;;  %p379_p5 = scmp.lt.u32.totalorder %s591_s28, %s732_s0 }
  0x1a   : > { %p376_p4 = pnand %p375_p3, %p374_p2  ;;  %p380_p8 = scmp.lt.u32.totalorder %s378_s8, %s373_s5 }
  0x1b   : > { %p382_p9 = scmp.lt.u32.totalorder %s373_s5, %s591_s28 }
  0x1c   : > { %p377_p7 = pneg %p376_p4  ;;  %p381_p10 = por %p380_p8, %p379_p5 }
  0x1e   : > { %p383_p0 = por %p382_p9, %p381_p10 }
  0x20   : > { %p384_p1 = pnand %p383_p0, %p377_p7 }
  0x22   : > { %387 = shalt.err (!%p384_p1)
}
  0x23   : > { %s388_s17 = scalar_lea.vmem %s601_s30, 128  ;;  %s505_s19 = smov [#allocation2]  }
  0x24   : > { %p389_p2 = scmp.ne.s32.totalorder %s601_s30, %s388_s17  ;;  %s393_s26 = sshll.u32 %s505_s19, 4  ;;  %s394_s26 = int_to_ptr.vmem [resolvable:$false] %s393_s26 }
  0x25   : > { %s395_s27 = scalar_lea.vmem %s394_s26, 256  ;;  %p396_p11 = scmp.lt.s32.totalorder %s601_s30, %s394_s26 }
  0x26   : > { %p391_p4 = pnand %p389_p2, %p375_p3  ;;  %p397_p5 = scmp.lt.s32.totalorder %s395_s27, %s388_s17 }
  0x28   : > { %p392_p12 = pneg %p391_p4  ;;  %p398_p8 = por %p397_p5, %p396_p11 }
  0x2a   : > { %p399_p9 = pnand %p398_p8, %p392_p12 }
  0x2c   : > { %402 = shalt.err (!%p399_p9)
}
  0x2d   : > { %331 = dma.hbm_to_vmem [thread:$0]  (!%p597_p13), %s591_s28, 128, %s601_s30, %s118_s4  }
  0x2e   : > { %p742_p0 = scmp.lt.s32.totalorder %s503_s12, 3  ;;  %p743_p1 = scmp.ge.s32.totalorder %s503_s12, 1 }
  0x2f   : > { %s644_s7 = scalar_lea.hbm %s733_s1, %s311_s24  ;;  %s139_s8 = scalar_lea.vmem [#allocation5], %s310_s25 }
  0x30   : > { %p635_p7 = pnand %p743_p1, %p742_p0  ;;  %s146_s14 = sshll.u32 %s139_s8, 4  ;;  %s147_s14 = int_to_ptr.vmem [resolvable:$true] %s146_s14 }
  0x31   : > { %s136_s28 = scalar_lea.sflag [#allocation6], %s582_s23  ;;  %s403_s30 = scalar_lea.hbm %s644_s7, 128 }
  0x32   : > { %s744_s29 = scalar_select %p635_p7, 1, 0 }
  0x33   : > { %p404_p11 = scmp.ne.s32.totalorder %s644_s7, %s403_s30  ;;  %s408_s24 = scalar_lea.hbm %s733_s1, 256 }
  0x34   : > { %p409_p2 = scmp.lt.u32.totalorder %s644_s7, %s733_s1  ;;  %p410_p4 = scmp.lt.u32.totalorder %s408_s24, %s403_s30 }
  0x35   : > { %p406_p12 = pnand %p404_p11, %p375_p3  ;;  %p412_p8 = scmp.lt.u32.totalorder %s403_s30, %s644_s7 }
  0x36   : > { %p411_p5 = por %p410_p4, %p409_p2 }
  0x37   : > { %p407_p10 = pneg %p406_p12 }
  0x38   : > { %p413_p9 = por %p412_p8, %p411_p5 }
  0x3a   : > { %p414_p0 = pnand %p413_p9, %p407_p10 }
  0x3c   : > { %417 = shalt.err (!%p414_p0)
}
  0x3d   : > { %s418_s23 = scalar_lea.vmem %s147_s14, 128  ;;  %s506_s25 = smov [#allocation5]  }
  0x3e   : > { %p419_p1 = scmp.ne.s32.totalorder %s147_s14, %s418_s23  ;;  %s423_s26 = sshll.u32 %s506_s25, 4  ;;  %s424_s26 = int_to_ptr.vmem [resolvable:$false] %s423_s26 }
  0x3f   : > { %s425_s27 = scalar_lea.vmem %s424_s26, 256  ;;  %p426_p6 = scmp.lt.s32.totalorder %s147_s14, %s424_s26 }
  0x40   : > { %p421_p11 = pnand %p419_p1, %p375_p3  ;;  %p427_p7 = scmp.lt.s32.totalorder %s425_s27, %s418_s23 }
  0x42   : > { %p422_p12 = pneg %p421_p11  ;;  %p428_p2 = por %p427_p7, %p426_p6 }
  0x44   : > { %p429_p4 = pnand %p428_p2, %p422_p12 }
  0x46   : > { %432 = shalt.err (!%p429_p4)
}
  0x47   : > { %334 = dma.hbm_to_vmem [thread:$0]  (!%p597_p13), %s644_s7, 128, %s147_s14, %s136_s28  }
  0x48   : > { %p745_p10 = scmp.ne.s32.totalorder %s744_s29, 0 }
  0x49   : > { %s671_s5 = sand.u32 (!%p745_p10), 1, %s495_s10   ;;  %p746_p3 = scmp.ne.s32.totalorder (!%p745_p10), %s738_s20, 0 }
  0x4a   : > { %155 = sbr.rel (%p745_p10) target bundleno = 110 (0x6e), region = 28  ;;  %s315_s6 = sshll.u32 (!%p745_p10), %s671_s5, 3 }
  0x4b   : > { %s158_s8 = scalar_lea.sflag (!%p745_p10), [#allocation3], %s671_s5  ;;  %s161_s30 = scalar_lea.vmem (!%p745_p10), [#allocation2], %s315_s6 }
  0x51   : > { %478 = dma.done.wait (%p746_p3), %s158_s8, 128  }
  0x52   : > { %480 = vsyncadd (%p746_p3), %s158_s8, 4294967168  ;;  %s167_s3 = scalar_lea.sflag [#allocation6], %s671_s5  ;;  %s170_s7 = scalar_lea.vmem [#allocation5], %s315_s6 }
  0x53   : > { %482 = dma.done.wait (%p746_p3), %s167_s3, 128  }
  0x54   : > { %484 = vsyncadd (%p746_p3), %s167_s3, 4294967168  ;;  %s195_s29 = scalar_lea.vmem [#allocation7], %s315_s6  ;;  %s319_s28 = sshll.u32 %s544_s13, 7  ;;  %v196_v0 = vld [vmem:[%s161_s30] sm:$0xff]  ;;  %v197_v1 = vld [vmem:[%s170_s7] sm:$0xff] }
  0x55   : > { %s214_s14 = sshll.u32 %s195_s29, 4  ;;  %v198_v2 = vadd.f32 %v197_v1, %v196_v0  ;;  %s690_s24 = scalar_lea.hbm %s734_s2, %s319_s28  ;;  %s685_s14 = int_to_ptr.vmem [resolvable:$true] %s214_s14 }
  0x56   : > { %s201_s20 = scalar_lea.sflag [#allocation4], %s671_s5  ;;  %s433_s17 = scalar_lea.vmem %s685_s14, 128 }
  0x57   : > { %199 = vst [vmem:[%s195_s29] sm:$0xff] %v198_v2  ;;  %p434_p6 = scmp.ne.s32.totalorder %s685_s14, %s433_s17  ;;  %p747_p13 = scmp.ne.s32.totalorder %s739_s21, 0 }
  0x58   : > { %s507_s13 = smov [#allocation7]  }
  0x59   : > { %p435_p7 = pnand %p434_p6, %p747_p13  ;;  %s437_s19 = sshll.u32 %s507_s13, 4  ;;  %s438_s19 = int_to_ptr.vmem [resolvable:$false] %s437_s19 }
  0x5a   : > { %s439_s23 = scalar_lea.vmem %s438_s19, 256  ;;  %p440_p8 = scmp.lt.s32.totalorder %s685_s14, %s438_s19 }
  0x5b   : > { %p436_p5 = pneg %p435_p7  ;;  %p441_p9 = scmp.lt.s32.totalorder %s439_s23, %s433_s17 }
  0x5d   : > { %p442_p0 = por %p441_p9, %p440_p8 }
  0x5f   : > { %p443_p1 = pnand %p442_p0, %p436_p5 }
  0x61   : > { %446 = shalt.err (!%p443_p1)
}
  0x62   : > { %s447_s25 = scalar_lea.hbm %s690_s24, 128  ;;  %s451_s5 = scalar_lea.hbm %s734_s2, 256 }
  0x63   : > { %p448_p11 = scmp.ne.s32.totalorder %s690_s24, %s447_s25  ;;  %p452_p4 = scmp.lt.u32.totalorder %s690_s24, %s734_s2 }
  0x64   : > { %p453_p10 = scmp.lt.u32.totalorder %s451_s5, %s447_s25  ;;  %p455_p6 = scmp.lt.u32.totalorder %s447_s25, %s690_s24 }
  0x65   : > { %p449_p12 = pnand %p448_p11, %p747_p13 }
  0x66   : > { %p454_p3 = por %p453_p10, %p452_p4 }
  0x67   : > { %p450_p2 = pneg %p449_p12 }
  0x68   : > { %p456_p7 = por %p455_p6, %p454_p3 }
  0x6a   : > { %p457_p5 = pnand %p456_p7, %p450_p2 }
  0x6c   : > { %460 = shalt.err (!%p457_p5)
}
  0x6d   : > { %326 = dma.vmem_to_hbm [thread:$0]  (%p747_p13), %s685_s14, 128, %s690_s24, %s201_s20  }
  0x6e PF: > { %s226_s30 = sand.u32 1, %s491_s9   ;;  %p748_p8 = scmp.ne.s32.totalorder %s740_s22, 0 }
  0x6f   : > { %p749_p9 = scmp.ge.s32.totalorder %s503_s12, 2  ;;  %s227_s3 = scalar_lea.sflag [#allocation4], %s226_s30 }
  0x71   : > { %p336_p0 = pnand %p749_p9, %p748_p8 }
  0x73   : > { %486 = dma.done.wait (!%p336_p0), %s227_s3, 128  }
  0x74   : > { %488 = vsyncadd (!%p336_p0), %s227_s3, 4294967168  ;;  %p18_p1 = scmp.ge.s32.totalorder %s548_s15, 4   ;;  %s750_s9 = smov %s495_s10 }
  0x75   : > { %s751_s10 = smov %s499_s11  ;;  %s752_s11 = smov %s560_s18 }
  0x76   : > { %s753_s12 = smov %s548_s15  ;;  %20 = sbr.rel (!%p18_p1) target bundleno = 7 (0x7), region = 86 }
  0x7d   :  { %232 = vsyncpa [#allocation3], 1 }
  0x7e   :  { %234 = vsyncpa [#allocation3 + $0x1], 1 }
  0x7f   :  { %235 = vsyncpa [#allocation6], 1 }
  0x80   :  { %237 = vsyncpa [#allocation6 + $0x1], 1 }
  0x81   :  { %238 = vsyncpa [#allocation4], 1 }
  0x82   :  { %240 = vsyncpa [#allocation4 + $0x1], 1 }

</bundles_post_ra>
